<compile_context>
chip_gen: v7x
topology: tpu7x:2x2x1
jax: 0.10.0
libtpu: 0.0.40
codegen_flags: <defaults>
</compile_context>

<pallas_src>
import functools

import jax
import jax.numpy as jnp
from jax.experimental import pallas as pl
from jax.experimental.pallas import tpu as pltpu

_LANE = 128


def _round_up(x, m):
    return ((x + m - 1) // m) * m


def _choose_block(total, target, granule=_LANE):
    """Pick a block size (multiple of `granule`, <= ~target), preferring one
    that divides `total` exactly so no padding is needed."""
    target = max(granule, (target // granule) * granule)
    if total % granule == 0:
        best = granule
        d = granule
        limit = min(total, target)
        while d <= limit:
            if total % d == 0:
                best = d
            d += granule
        return best
    return min(target, _round_up(total, granule))


# ----------------------------------------------------------------------------
# Dice loss (this is what CombinedLoss.forward returns).
# ----------------------------------------------------------------------------
def _dice_partial_kernel(pr_ref, gt_ref, tp_ref, sp_ref, sg_ref):
    pr = pr_ref[0]                       # (C, bhw) f32
    gt = gt_ref[0]                       # (C, bhw) f32
    # Per-channel partial sums for this (image, spatial-chunk) grid cell.
    tp_ref[0, 0] = jnp.sum(gt * pr, axis=-1, keepdims=True)   # (C, 1)
    sp_ref[0, 0] = jnp.sum(pr, axis=-1, keepdims=True)        # (C, 1)
    sg_ref[0, 0] = jnp.sum(gt, axis=-1, keepdims=True)        # (C, 1)


def dice_loss(pr, gt, beta=1.0, smooth=1e-5, class_weights=None,
              block_elems=256 * 1024):
    """Pallas implementation of DiceLoss.forward (NCHW inputs).

    Sums gt*pr, pr, gt over (N, H, W) per channel inside the kernel; the tiny
    per-channel score/mean math happens in the wrapper.
    """
    assert pr.shape == gt.shape and pr.ndim == 4
    N, C, H, W = pr.shape
    HW = H * W

    # NCHW is already (N, C, H*W)-contiguous: reshape is free, no transpose
    # needed (the reduction axes [0, 1, 2] in NHWC == [0, 2, 3] in NCHW).
    pr3 = pr.astype(jnp.float32).reshape(N, C, HW)
    gt3 = gt.astype(jnp.float32).reshape(N, C, HW)

    # Spatial tile: ~block_elems f32 per input per buffer, accounting for the
    # channel dim being padded to 8 sublanes inside vregs.
    c_sub = _round_up(C, 8)
    bhw_target = max(_LANE, ((block_elems // c_sub) // _LANE) * _LANE)
    bhw = _choose_block(HW, bhw_target, _LANE)
    HWp = _round_up(HW, bhw)
    if HWp != HW:
        # Zero padding is exactly neutral for all three sums.
        pad = HWp - HW
        pr3 = jnp.pad(pr3, ((0, 0), (0, 0), (0, pad)))
        gt3 = jnp.pad(gt3, ((0, 0), (0, 0), (0, pad)))
    J = HWp // bhw

    in_spec = pl.BlockSpec((1, C, bhw), lambda n, j: (n, 0, j))
    out_spec = pl.BlockSpec((1, 1, C, 1), lambda n, j: (n, j, 0, 0))
    out_sds = jax.ShapeDtypeStruct((N, J, C, 1), jnp.float32)

    tp_p, sp_p, sg_p = pl.pallas_call(
        _dice_partial_kernel,
        out_shape=(out_sds, out_sds, out_sds),
        grid_spec=pltpu.PrefetchScalarGridSpec(
            num_scalar_prefetch=0,
            grid=(N, J),
            in_specs=[in_spec, in_spec],
            out_specs=(out_spec, out_spec, out_spec),
        ),
        compiler_params=pltpu.CompilerParams(
            dimension_semantics=("parallel", "parallel")),
    )(pr3, gt3)

    # Tiny final reduction + score math in plain JAX.
    tp = jnp.sum(tp_p, axis=(0, 1))[:, 0]     # (C,)
    sp = jnp.sum(sp_p, axis=(0, 1))[:, 0]
    sg = jnp.sum(sg_p, axis=(0, 1))[:, 0]
    fp = sp - tp
    fn = sg - tp
    b2 = float(beta) ** 2
    score = ((1.0 + b2) * tp + smooth) / ((1.0 + b2) * tp + b2 * fn + fp + smooth)
    if class_weights is not None:
        score = score * jnp.asarray(class_weights, jnp.float32)
    return 1.0 - jnp.mean(score)


def combined_loss(pr, gt, class_weights=None):
    """CombinedLoss.forward: returns only the Dice loss (matches the spec)."""
    return dice_loss(pr, gt, beta=1.0, smooth=1e-5, class_weights=class_weights)


# ----------------------------------------------------------------------------
# Categorical focal loss (submodule of CombinedLoss; unused by its forward).
# ----------------------------------------------------------------------------
def _focal_partial_kernel(gt_ref, pr_ref, out_ref, *, alpha, gamma):
    eps = 1e-07
    pr = jnp.clip(pr_ref[...], eps, 1.0 - eps)
    gt = gt_ref[...]
    one_minus = 1.0 - pr
    if gamma == 2.0:                       # common case: VPU muls, no exp/log
        mod = one_minus * one_minus
    elif gamma == 1.0:
        mod = one_minus
    elif gamma == 0.0:
        mod = jnp.ones_like(pr)
    else:
        mod = jnp.power(one_minus, gamma)
    loss = gt * ((-alpha) * mod * jnp.log(pr))
    # Sublane-only reduction (VPU adds) -> lane-dense (1, 128) partial.
    out_ref[0] = jnp.sum(loss, axis=0, keepdims=True)


def categorical_focal_loss(pr, gt, alpha=0.25, gamma=2.0, block_rows=1024):
    """Pallas implementation of CategoricalFocalLoss.forward (NCHW inputs).

    The mean is permutation-invariant, so no transpose is performed; inputs
    are flattened (free reshape) into a lane-dense (rows, 128) slab.
    `class_indexes` is never applied in the reference forward, so not here.
    """
    assert pr.shape == gt.shape
    n_elems = pr.size
    pr_flat = pr.astype(jnp.float32).reshape(-1)
    gt_flat = gt.astype(jnp.float32).reshape(-1)

    rows = pl.cdiv(n_elems, _LANE)
    br = _round_up(max(8, min(block_rows, _round_up(rows, 8))), 8)
    rows_p = _round_up(rows, br)
    padded = rows_p * _LANE
    if padded != n_elems:
        # gt padded with 0 -> zero contribution; clip keeps log(pr) finite.
        pr_flat = jnp.pad(pr_flat, (0, padded - n_elems))
        gt_flat = jnp.pad(gt_flat, (0, padded - n_elems))
    pr2 = pr_flat.reshape(rows_p, _LANE)
    gt2 = gt_flat.reshape(rows_p, _LANE)

    nblk = rows_p // br
    kernel = functools.partial(_focal_partial_kernel,
                               alpha=float(alpha), gamma=float(gamma))

    partials = pl.pallas_call(
        kernel,
        out_shape=jax.ShapeDtypeStruct((nblk, 1, _LANE), jnp.float32),
        grid_spec=pltpu.PrefetchScalarGridSpec(
            num_scalar_prefetch=0,
            grid=(nblk,),
            in_specs=[pl.BlockSpec((br, _LANE), lambda i: (i, 0)),
                      pl.BlockSpec((br, _LANE), lambda i: (i, 0))],
            out_specs=pl.BlockSpec((1, 1, _LANE), lambda i: (i, 0, 0)),
        ),
        compiler_params=pltpu.CompilerParams(
            dimension_semantics=("parallel",)),
    )(gt2, pr2)

    return jnp.sum(partials) / jnp.float32(n_elems)


# ----------------------------------------------------------------------------
# Pure-JAX references (mirror the PyTorch modules).
# ----------------------------------------------------------------------------
def _dice_reference(pr, gt, beta=1.0, smooth=1e-5, class_weights=None):
    gtp = jnp.transpose(gt, (0, 2, 3, 1)).astype(jnp.float32)
    prp = jnp.transpose(pr, (0, 2, 3, 1)).astype(jnp.float32)
    axes = (0, 1, 2)
    tp = jnp.sum(gtp * prp, axis=axes)
    fp = jnp.sum(prp, axis=axes) - tp
    fn = jnp.sum(gtp, axis=axes) - tp
    b2 = beta ** 2
    score = ((1 + b2) * tp + smooth) / ((1 + b2) * tp + b2 * fn + fp + smooth)
    if class_weights is not None:
        score = score * jnp.asarray(class_weights, jnp.float32)
    return 1.0 - jnp.mean(score)


def _focal_reference(pr, gt, alpha=0.25, gamma=2.0):
    eps = 1e-07
    prc = jnp.clip(pr.astype(jnp.float32), eps, 1.0 - eps)
    loss = -gt.astype(jnp.float32) * (alpha * jnp.power(1.0 - prc, gamma)
                                      * jnp.log(prc))
    return jnp.mean(loss)


if __name__ == "__main__":
    key = jax.random.PRNGKey(0)
    k1, k2 = jax.random.split(key)

    B, C, H, W = 2, 4, 16, 16  # NCHW, as in the PyTorch module
    logits = jax.random.normal(k1, (B, C, H, W), dtype=jnp.float32)
    pr = jax.nn.softmax(logits, axis=1)          # probabilities over channels
    labels = jax.random.randint(k2, (B, H, W), 0, C)
    gt = jnp.transpose(jax.nn.one_hot(labels, C, dtype=jnp.float32),
                       (0, 3, 1, 2))             # one-hot NCHW ground truth

    # CombinedLoss.forward == Dice loss only.
    dice = jax.block_until_ready(combined_loss(pr, gt))
    dice_ref = _dice_reference(pr, gt)
    assert jnp.allclose(dice, dice_ref, rtol=1e-5, atol=1e-6), (dice, dice_ref)

    # Focal-loss submodule (not part of the returned value; validated anyway).
    focal = jax.block_until_ready(categorical_focal_loss(pr, gt))
    focal_ref = _focal_reference(pr, gt)
    assert jnp.allclose(focal, focal_ref, rtol=1e-5, atol=1e-6), (focal, focal_ref)

    print("KERNEL_OK")
</pallas_src>

<mosaic_0001>
module attributes {stable_mosaic.version = 11 : i64} {
  func.func @_dice_partial_kernel(%arg0: i32, %arg1: i32, %arg2: memref<1x4x256xf32, #tpu.memory_space<vmem>>, %arg3: memref<1x4x256xf32, #tpu.memory_space<vmem>>, %arg4: memref<1x1x4x1xf32, #tpu.memory_space<vmem>>, %arg5: memref<1x1x4x1xf32, #tpu.memory_space<vmem>>, %arg6: memref<1x1x4x1xf32, #tpu.memory_space<vmem>>) attributes {dimension_semantics = [#tpu.dimension_semantics<parallel>, #tpu.dimension_semantics<parallel>], iteration_bounds = array<i64: 2, 1>, scalar_prefetch = 0 : i64, scratch_operands = 0 : i64, tpu.core_type = #tpu.core_type<tc>, window_params = [{transform_indices = @transform_0, window_bounds = array<i64: 1, 4, 256>}, {transform_indices = @transform_1, window_bounds = array<i64: 1, 4, 256>}, {transform_indices = @transform_2, window_bounds = array<i64: 1, 1, 4, 1>}, {transform_indices = @transform_3, window_bounds = array<i64: 1, 1, 4, 1>}, {transform_indices = @transform_4, window_bounds = array<i64: 1, 1, 4, 1>}]} {
    %c0 = arith.constant 0 : index
    %c0_0 = arith.constant 0 : index
    %c0_1 = arith.constant 0 : index
    %0 = vector.load %arg2[%c0, %c0_0, %c0_1] : memref<1x4x256xf32, #tpu.memory_space<vmem>>, vector<1x4x256xf32>
    %1 = vector.shape_cast %0 : vector<1x4x256xf32> to vector<4x256xf32>
    %c0_2 = arith.constant 0 : index
    %c0_3 = arith.constant 0 : index
    %c0_4 = arith.constant 0 : index
    %2 = vector.load %arg3[%c0_2, %c0_3, %c0_4] : memref<1x4x256xf32, #tpu.memory_space<vmem>>, vector<1x4x256xf32>
    %3 = vector.shape_cast %2 : vector<1x4x256xf32> to vector<4x256xf32>
    %4 = arith.mulf %3, %1 : vector<4x256xf32>
    %cst = arith.constant dense<0.000000e+00> : vector<4xf32>
    %5 = vector.multi_reduction <add>, %4, %cst [1] : vector<4x256xf32> to vector<4xf32>
    %6 = vector.shape_cast %5 : vector<4xf32> to vector<4x1xf32>
    %c0_5 = arith.constant 0 : index
    %c0_6 = arith.constant 0 : index
    %c0_7 = arith.constant 0 : index
    %c0_8 = arith.constant 0 : index
    %7 = vector.load %arg4[%c0_5, %c0_6, %c0_7, %c0_8] : memref<1x1x4x1xf32, #tpu.memory_space<vmem>>, vector<1x1x4x1xf32>
    %8 = vector.shape_cast %7 : vector<1x1x4x1xf32> to vector<4x1xf32>
    %9 = vector.shape_cast %6 : vector<4x1xf32> to vector<1x1x4x1xf32>
    tpu.vector_store %arg4[%c0_5, %c0_6, %c0_7, %c0_8], %9 {strides = array<i32>} : memref<1x1x4x1xf32, #tpu.memory_space<vmem>>, vector<1x1x4x1xf32>,
    %cst_9 = arith.constant dense<0.000000e+00> : vector<4xf32>
    %10 = vector.multi_reduction <add>, %1, %cst_9 [1] : vector<4x256xf32> to vector<4xf32>
    %11 = vector.shape_cast %10 : vector<4xf32> to vector<4x1xf32>
    %c0_10 = arith.constant 0 : index
    %c0_11 = arith.constant 0 : index
    %c0_12 = arith.constant 0 : index
    %c0_13 = arith.constant 0 : index
    %12 = vector.load %arg5[%c0_10, %c0_11, %c0_12, %c0_13] : memref<1x1x4x1xf32, #tpu.memory_space<vmem>>, vector<1x1x4x1xf32>
    %13 = vector.shape_cast %12 : vector<1x1x4x1xf32> to vector<4x1xf32>
    %14 = vector.shape_cast %11 : vector<4x1xf32> to vector<1x1x4x1xf32>
    tpu.vector_store %arg5[%c0_10, %c0_11, %c0_12, %c0_13], %14 {strides = array<i32>} : memref<1x1x4x1xf32, #tpu.memory_space<vmem>>, vector<1x1x4x1xf32>,
    %cst_14 = arith.constant dense<0.000000e+00> : vector<4xf32>
    %15 = vector.multi_reduction <add>, %3, %cst_14 [1] : vector<4x256xf32> to vector<4xf32>
    %16 = vector.shape_cast %15 : vector<4xf32> to vector<4x1xf32>
    %c0_15 = arith.constant 0 : index
    %c0_16 = arith.constant 0 : index
    %c0_17 = arith.constant 0 : index
    %c0_18 = arith.constant 0 : index
    %17 = vector.load %arg6[%c0_15, %c0_16, %c0_17, %c0_18] : memref<1x1x4x1xf32, #tpu.memory_space<vmem>>, vector<1x1x4x1xf32>
    %18 = vector.shape_cast %17 : vector<1x1x4x1xf32> to vector<4x1xf32>
    %19 = vector.shape_cast %16 : vector<4x1xf32> to vector<1x1x4x1xf32>
    tpu.vector_store %arg6[%c0_15, %c0_16, %c0_17, %c0_18], %19 {strides = array<i32>} : memref<1x1x4x1xf32, #tpu.memory_space<vmem>>, vector<1x1x4x1xf32>,
    return
  }
  func.func @transform_0(%arg0: i32, %arg1: i32) -> (i32, i32, i32) {
    %c0_i32 = arith.constant 0 : i32
    %c0_i32_0 = arith.constant 0 : i32
    return %arg0, %c0_i32, %arg1 : i32, i32, i32
  }
  func.func @transform_1(%arg0: i32, %arg1: i32) -> (i32, i32, i32) {
    %c0_i32 = arith.constant 0 : i32
    %c0_i32_0 = arith.constant 0 : i32
    return %arg0, %c0_i32, %arg1 : i32, i32, i32
  }
  func.func @transform_2(%arg0: i32, %arg1: i32) -> (i32, i32, i32, i32) {
    %c0_i32 = arith.constant 0 : i32
    %c0_i32_0 = arith.constant 0 : i32
    %c0_i32_1 = arith.constant 0 : i32
    return %arg0, %arg1, %c0_i32, %c0_i32_0 : i32, i32, i32, i32
  }
  func.func @transform_3(%arg0: i32, %arg1: i32) -> (i32, i32, i32, i32) {
    %c0_i32 = arith.constant 0 : i32
    %c0_i32_0 = arith.constant 0 : i32
    %c0_i32_1 = arith.constant 0 : i32
    return %arg0, %arg1, %c0_i32, %c0_i32_0 : i32, i32, i32, i32
  }
  func.func @transform_4(%arg0: i32, %arg1: i32) -> (i32, i32, i32, i32) {
    %c0_i32 = arith.constant 0 : i32
    %c0_i32_0 = arith.constant 0 : i32
    %c0_i32_1 = arith.constant 0 : i32
    return %arg0, %arg1, %c0_i32, %c0_i32_0 : i32, i32, i32, i32
  }
}

</mosaic_0001>

<bundles_post_ra>
// kernel: tpu_custom_call.1
= control target key start
LH: loop header
LB: loop body
LE: loop exit
PB: predicated region body
PF: predicated region fallthrough
CT: control target
= control target key end

     0   :  { %10 = vsyncpa [#allocation3], 0  ;;  %s948_s0 = inlined_call_operand.hbm [shape: f32[2,4,256], index: 0, kind: input, shape index: {}]   ;;  %s949_s1 = inlined_call_operand.hbm [shape: f32[2,4,256], index: 1, kind: input, shape index: {}]   ;;  %s950_s2 = inlined_call_operand.vmem [shape: f32[2,1,4,1], index: 2, kind: output, shape index: {0}]   ;;  %s951_s3 = inlined_call_operand.vmem [shape: f32[2,1,4,1], index: 3, kind: output, shape index: {1}]   ;;  %s952_s4 = inlined_call_operand.vmem [shape: f32[2,1,4,1], index: 4, kind: output, shape index: {2}]  }
   0x1   :  { %12 = vsyncpa [#allocation3 + $0x1], 0 }
   0x2   :  { %13 = vsyncpa [#allocation5], 0 }
   0x3   :  { %15 = vsyncpa [#allocation5 + $0x1], 0  ;;  %s770_s15 = smov 0   ;;  %s772_s16 = smov 0  }
   0x4   :  { %s774_s17 = smov 0   ;;  %s776_s18 = smov 0  }
   0x5   :  { %s778_s19 = smov 0   ;;  %s780_s20 = smov 0  }
   0x6 LB: > { %s545_s21 = sadd.s32 4294967295, %s741_s20   ;;  %s33_s22 = sadd.s32 1, %s737_s19  ;;  %s741_s20 = sphi %s780_s20, %s21_s20   ;;  %s737_s19 = sphi %s778_s19, %s966_s19   ;;  %s733_s18 = sphi %s776_s18, %s965_s18   ;;  %s729_s17 = sphi %s774_s17, %s964_s17   ;;  %s725_s16 = sphi %s772_s16, %s963_s16   ;;  %s721_s15 = sphi %s770_s15, %s962_s15  }
   0x7   : > { %p35_p0 = scmp.ge.s32.totalorder %s33_s22, 2  ;;  %s42_s23 = sadd.s32 1, %s729_s17 }
   0x8   : > { %p49_p1 = scmp.ne.s32.totalorder %s729_s17, %s725_s16  ;;  %p50_p2 = scmp.eq.s32.totalorder %s741_s20, 0 }
   0x9   : > { %s968_s22 = smov (%p35_p0, %s33_s22), 0  ;;  %p55_p4 = scmp.ne.s32.totalorder %s725_s16, %s721_s15 }
   0xa   : > { %p806_p3 = por %p50_p2, %p49_p1  ;;  %s37_s25 = ssub.s32 %s737_s19, %s968_s22 }
   0xb   : > { %p56_p5 = scmp.eq.s32.totalorder %s545_s21, 0  ;;  %p40_p6 = scmp.eq.s32.totalorder %s37_s25, 0 }
   0xc   : > { %p576_p8 = scmp.lt.s32.totalorder %s741_s20, 2  ;;  %s822_s28 = sand.u32 1, %s729_s17  }
   0xd   : > { %p813_p7 = por %p56_p5, %p55_p4  ;;  %s563_s29 = sshll.u32 %s737_s19, 7 }
   0xe   : > { %s819_s27 = scalar_select %p40_p6, %s729_s17, %s42_s23  }
   0xf   : > { %s955_s26 = scalar_select %p813_p7, 1, 0 }
  0x10   : > { %s549_s30 = sshll.u32 %s822_s28, 3  ;;  %s831_s7 = scalar_lea.hbm %s948_s0, %s563_s29 }
  0x11   : > { %s195_s8 = scalar_lea.vmem [#allocation2], %s549_s30  ;;  %p837_p9 = pnand %p576_p8, %p806_p3 }
  0x12   : > { %s205_s9 = sshll.u32 %s195_s8, 4  ;;  %s192_s11 = scalar_lea.sflag [#allocation3], %s822_s28  ;;  %s841_s9 = int_to_ptr.vmem [resolvable:$true] %s205_s9 }
  0x13   : > { %s627_s12 = scalar_lea.hbm %s831_s7, 128  ;;  %p629_p13 = pneg %p837_p9 }
  0x14   : > { %p628_p12 = scmp.ne.s32.totalorder %s831_s7, %s627_s12  ;;  %s632_s15 = scalar_lea.hbm %s948_s0, 256 }
  0x15   : > { %p633_p2 = scmp.lt.u32.totalorder %s831_s7, %s948_s0  ;;  %p634_p3 = scmp.lt.u32.totalorder %s632_s15, %s627_s12 }
  0x16   : > { %p630_p0 = pnand %p629_p13, %p628_p12  ;;  %p636_p5 = scmp.lt.u32.totalorder %s627_s12, %s831_s7 }
  0x17   : > { %p635_p4 = por %p634_p3, %p633_p2 }
  0x18   : > { %p631_p1 = pneg %p630_p0 }
  0x19   : > { %p637_p6 = por %p636_p5, %p635_p4 }
  0x1b   : > { %p638_p8 = pnand %p637_p6, %p631_p1 }
  0x1d   : > { %641 = shalt.err (!%p638_p8)
}
  0x1e   : > { %s642_s24 = scalar_lea.vmem %s841_s9, 128  ;;  %s743_s25 = smov [#allocation2]  }
  0x1f   : > { %p643_p12 = scmp.ne.s32.totalorder %s841_s9, %s642_s24  ;;  %s647_s5 = sshll.u32 %s743_s25, 4  ;;  %s648_s5 = int_to_ptr.vmem [resolvable:$false] %s647_s5 }
  0x20   : > { %s649_s6 = scalar_lea.vmem %s648_s5, 256  ;;  %p650_p11 = scmp.lt.s32.totalorder %s841_s9, %s648_s5 }
  0x21   : > { %p645_p0 = pnand %p643_p12, %p629_p13  ;;  %p651_p2 = scmp.lt.s32.totalorder %s649_s6, %s642_s24 }
  0x23   : > { %p646_p10 = pneg %p645_p0  ;;  %p652_p3 = por %p651_p2, %p650_p11 }
  0x25   : > { %p653_p4 = pnand %p652_p3, %p646_p10 }
  0x27   : > { %656 = shalt.err (!%p653_p4)
}
  0x28   : > { %572 = dma.hbm_to_vmem [thread:$0]  (!%p837_p9), %s831_s7, 128, %s841_s9, %s192_s11  }
  0x29   : > { %p957_p1 = scmp.lt.s32.totalorder %s741_s20, 3  ;;  %p958_p5 = scmp.ge.s32.totalorder %s741_s20, 1 }
  0x2a   : > { %s884_s14 = scalar_lea.hbm %s949_s1, %s563_s29  ;;  %s216_s15 = scalar_lea.vmem [#allocation4], %s549_s30 }
  0x2b   : > { %p875_p6 = pnand %p958_p5, %p957_p1  ;;  %s226_s21 = sshll.u32 %s216_s15, 4  ;;  %s227_s21 = int_to_ptr.vmem [resolvable:$true] %s226_s21 }
  0x2c   : > { %s213_s7 = scalar_lea.sflag [#allocation5], %s822_s28  ;;  %s657_s9 = scalar_lea.hbm %s884_s14, 128 }
  0x2d   : > { %s959_s8 = scalar_select %p875_p6, 1, 0 }
  0x2e   : > { %p658_p10 = scmp.ne.s32.totalorder %s884_s14, %s657_s9  ;;  %s662_s29 = scalar_lea.hbm %s949_s1, 256 }
  0x2f   : > { %p663_p12 = scmp.lt.u32.totalorder %s884_s14, %s949_s1  ;;  %p664_p0 = scmp.lt.u32.totalorder %s662_s29, %s657_s9 }
  0x30   : > { %p660_p11 = pnand %p658_p10, %p629_p13  ;;  %p666_p3 = scmp.lt.u32.totalorder %s657_s9, %s884_s14 }
  0x31   : > { %p665_p2 = por %p664_p0, %p663_p12 }
  0x32   : > { %p661_p8 = pneg %p660_p11 }
  0x33   : > { %p667_p4 = por %p666_p3, %p665_p2 }
  0x35   : > { %p668_p1 = pnand %p667_p4, %p661_p8 }
  0x37   : > { %671 = shalt.err (!%p668_p1)
}
  0x38   : > { %s672_s28 = scalar_lea.vmem %s227_s21, 128  ;;  %s744_s30 = smov [#allocation4]  }
  0x39   : > { %p673_p5 = scmp.ne.s32.totalorder %s227_s21, %s672_s28  ;;  %s677_s5 = sshll.u32 %s744_s30, 4  ;;  %s678_s5 = int_to_ptr.vmem [resolvable:$false] %s677_s5 }
  0x3a   : > { %s679_s6 = scalar_lea.vmem %s678_s5, 256  ;;  %p680_p7 = scmp.lt.s32.totalorder %s227_s21, %s678_s5 }
  0x3b   : > { %p675_p10 = pnand %p673_p5, %p629_p13  ;;  %p681_p6 = scmp.lt.s32.totalorder %s679_s6, %s672_s28 }
  0x3d   : > { %p676_p11 = pneg %p675_p10  ;;  %p682_p0 = por %p681_p6, %p680_p7 }
  0x3f   : > { %p683_p12 = pnand %p682_p0, %p676_p11 }
  0x41   : > { %686 = shalt.err (!%p683_p12)
}
  0x42   : > { %575 = dma.hbm_to_vmem [thread:$0]  (!%p837_p9), %s884_s14, 128, %s227_s21, %s213_s7  }
  0x43   : > { %p960_p8 = scmp.ne.s32.totalorder %s959_s8, 0 }
  0x44   : > { %s237_s12 = sand.u32 (!%p960_p8), 1, %s725_s16   ;;  %p961_p13 = scmp.ne.s32.totalorder (!%p960_p8), %s955_s26, 0 }
  0x45   : > { %235 = sbr.rel (%p960_p8) target bundleno = 234 (0xea), region = 28  ;;  %s556_s13 = sshll.u32 (!%p960_p8), %s237_s12, 3 }
  0x46   : > { %s238_s15 = scalar_lea.sflag (!%p960_p8), [#allocation3], %s237_s12  ;;  %s241_s9 = scalar_lea.vmem (!%p960_p8), [#allocation2], %s556_s13 }
  0x4c   : > { %712 = dma.done.wait (%p961_p13), %s238_s15, 128  }
  0x4d   : > { %714 = vsyncadd (%p961_p13), %s238_s15, 4294967168  ;;  %s247_s11 = scalar_lea.sflag [#allocation5], %s237_s12  ;;  %s250_s23 = scalar_lea.vmem [#allocation4], %s556_s13 }
  0x4e   : > { %716 = dma.done.wait (%p961_p13), %s247_s11, 128  }
  0x4f   : > { %718 = vsyncadd (%p961_p13), %s247_s11, 4294967168  ;;  %v319_v0 = vld [vmem:[%s241_s9] sm:$0xff]  ;;  %v320_v1 = vld [vmem:[%s250_s23] sm:$0xff]  ;;  %vm325_vm0 = vcmask 1043456   ;;  %p298_p7 = scmp.lt.s32.totalorder %s733_s18, 1  ;;  %vm331_vm1 = vcmask 3072  }
  0x50   : > { %v321_v2 = vmul.f32 %v320_v1, %v319_v0  ;;  %v343_v3 = vcombine.high %v320_v1, %v320_v1  ;;  %v345_v4 = vsel %vm325_vm0, %v320_v1, 0.0  ;;  %v334_v5 = vcombine.high %v319_v0, %v319_v0 }
  0x51   : > { %v336_v11 = vsel %vm325_vm0, %v319_v0, 0.0  ;;  %s970_s18 = smov (!%p298_p7, %s733_s18), 1 }
  0x52   : > { %v323_v6 = vcombine.high %v321_v2, %v321_v2  ;;  %v326_v7 = vsel %vm325_vm0, %v321_v2, 0.0  ;;  %v346_v8 = vsel %vm325_vm0, %v343_v3, 0.0  ;;  %v337_v12 = vsel %vm325_vm0, %v334_v5, 0.0  ;;  %s558_s26 = sshll.u32 %s970_s18, 2 }
  0x53   : > { %v347_v9 = vadd.f32 %v346_v8, %v345_v4  ;;  %v338_v14 = vadd.f32 %v337_v12, %v336_v11  ;;  %s318_s14 = scalar_lea.vmem %s952_s4, %s558_s26  ;;  %s304_s29 = scalar_lea.vmem %s950_s2, %s558_s26 }
  0x54   : > { %v327_v10 = vsel %vm325_vm0, %v323_v6, 0.0  ;;  %s311_s28 = scalar_lea.vmem %s951_s3, %s558_s26 }
  0x55   : > { %v328_v13 = vadd.f32 %v327_v10, %v326_v7  ;;  %348 = vadd.xlane.f32.xlu1 %v347_v9 }
  0x57   : > { %329 = vadd.xlane.f32.xlu0 %v328_v13 }
  0x5b   : > { %339 = vadd.xlane.f32.xlu0 %v338_v14 }
  0xe2   : > { %v349_v15 = vpop.xlane.xlu1 %348 }
  0xe3   : > { %350 = vst.msk [vmem:[%s318_s14] sm:$0xf] %vm331_vm1, %v349_v15 }
  0xe4   : > { %v330_v16 = vpop.xlane.xlu0 %329 }
  0xe5   : > { %332 = vst.msk [vmem:[%s304_s29] sm:$0xf] %vm331_vm1, %v330_v16 }
  0xe8   : > { %v340_v17 = vpop.xlane.xlu0 %339 }
  0xe9   : > { %341 = vst.msk [vmem:[%s311_s28] sm:$0xf] %vm331_vm1, %v340_v17 }
  0xea PF: > { %s21_s20 = sadd.s32 1, %s741_s20   ;;  %s962_s15 = smov %s725_s16 }
  0xeb   : > { %p18_p9 = scmp.ge.s32.totalorder %s21_s20, 4   ;;  %s963_s16 = smov %s729_s17 }
  0xec   : > { %s964_s17 = smov %s819_s27  ;;  %s965_s18 = smov %s737_s19 }
  0xed   : > { %s966_s19 = smov %s968_s22  ;;  %20 = sbr.rel (!%p18_p9) target bundleno = 6 (0x6), region = 105 }
  0xf4   :  { %416 = vsyncpa [#allocation3], 1 }
  0xf5   :  { %418 = vsyncpa [#allocation3 + $0x1], 1 }
  0xf6   :  { %419 = vsyncpa [#allocation5], 1 }
  0xf7   :  { %421 = vsyncpa [#allocation5 + $0x1], 1 }

</bundles_post_ra>
